<compile_context>
chip_gen: v6e
topology: v6e:2x2x1
jax: 0.10.0
libtpu: 0.0.40
codegen_flags: <defaults>
</compile_context>

<pallas_src>
import functools

import jax
import jax.numpy as jnp
from jax.experimental import pallas as pl
from jax.experimental.pallas import tpu as pltpu


def _linear_act_kernel(x_ref, wt_ref, b_ref, o_ref, *, activation: str):
    # x_ref:  (tile_b, Din)   VMEM
    # wt_ref: (Din, Dout)     VMEM (resident across grid steps)
    # b_ref:  (1, Dout)       VMEM, f32
    # o_ref:  (tile_b, Dout)  VMEM
    y = jnp.dot(x_ref[...], wt_ref[...], preferred_element_type=jnp.float32)
    y = y + b_ref[...]                      # f32 bias add
    if activation == "sigmoid":
        y = jax.nn.sigmoid(y)               # EUP, f32
    elif activation == "tanh":
        y = jnp.tanh(y)                     # EUP, f32
    else:
        raise ValueError(f"unsupported activation: {activation}")
    o_ref[...] = y.astype(o_ref.dtype)


def _pick_tile_b(B: int, max_tile: int = 2048) -> int:
    """Large batch tiles (amortize per-step overhead) but >=2 blocks for big B
    so the grid shards across both v7x TensorCores."""
    if B <= 8:
        return 8
    tile = min(max_tile, pl.cdiv(B, 2))     # at least 2 blocks
    return max(8, (tile // 8) * 8)          # f32 sublane alignment


def variable_activation_net(x, weight, bias, activation: str, *, tile_b=None):
    """x: (B, Din); weight: (Dout, Din) (PyTorch layout); bias: (Dout,)."""
    B, Din = x.shape
    Dout = weight.shape[0]
    assert weight.shape == (Dout, Din)
    assert bias.shape == (Dout,)

    # Glue: pre-transpose weight so lanes carry Dout; bias as f32 (1, Dout).
    wt = weight.T.astype(x.dtype)
    b2 = bias.astype(jnp.float32).reshape(1, Dout)

    if tile_b is None:
        tile_b = _pick_tile_b(B)
    tile_b = max(8, (min(int(tile_b), max(B, 8)) // 8) * 8)

    n_blocks = pl.cdiv(B, tile_b)
    B_pad = n_blocks * tile_b
    if B_pad != B:
        x = jnp.pad(x, ((0, B_pad - B), (0, 0)))  # padded rows sliced off below

    itemsize = jnp.dtype(x.dtype).itemsize
    cost = pl.CostEstimate(
        flops=2 * B_pad * Din * Dout,
        transcendentals=B_pad * Dout,
        bytes_accessed=itemsize * (B_pad * Din + Din * Dout + B_pad * Dout)
        + 4 * Dout,
    )

    kernel = functools.partial(_linear_act_kernel, activation=activation.lower())

    out = pl.pallas_call(
        kernel,
        out_shape=jax.ShapeDtypeStruct((B_pad, Dout), x.dtype),
        grid_spec=pl.GridSpec(
            grid=(n_blocks,),
            in_specs=[
                pl.BlockSpec((tile_b, Din), lambda i: (i, 0)),   # x tile
                pl.BlockSpec((Din, Dout), lambda i: (0, 0)),     # full weight (resident)
                pl.BlockSpec((1, Dout), lambda i: (0, 0)),       # bias (resident)
            ],
            out_specs=pl.BlockSpec((tile_b, Dout), lambda i: (i, 0)),
        ),
        compiler_params=pltpu.CompilerParams(
            dimension_semantics=("parallel",),
        ),
        cost_estimate=cost,
    )(x, wt, b2)

    return out[:B] if B_pad != B else out


def _reference(x, weight, bias, activation):
    y = x.astype(jnp.float32) @ weight.T.astype(jnp.float32) + bias
    return jax.nn.sigmoid(y) if activation.lower() == "sigmoid" else jnp.tanh(y)


if __name__ == "__main__":
    # Module hyperparameters: fc1 maps (H + W) -> H.
    len_hidden_state_vector = 32
    len_word_vector = 32
    din = len_hidden_state_vector + len_word_vector   # 64
    dout = len_hidden_state_vector                    # 32

    key = jax.random.PRNGKey(0)
    kw, kb, kx1, kx2 = jax.random.split(key, 4)

    # PyTorch-like init: uniform(-1/sqrt(fan_in), 1/sqrt(fan_in)).
    bound = 1.0 / jnp.sqrt(jnp.float32(din))
    weight = jax.random.uniform(kw, (dout, din), jnp.float32, -bound, bound)
    bias = jax.random.uniform(kb, (dout,), jnp.float32, -bound, bound)

    ok = True
    # batch=8: single-block path; batch=20: exercises cdiv + zero-padding path.
    for batch, kx in ((8, kx1), (20, kx2)):
        x = jax.random.normal(kx, (batch, din), jnp.float32)
        for act in ("sigmoid", "tanh"):
            out = jax.block_until_ready(
                variable_activation_net(x, weight, bias, act)
            )
            ref = _reference(x, weight, bias, act)
            if out.shape != ref.shape or not jnp.allclose(
                out, ref, atol=1e-5, rtol=1e-5
            ):
                ok = False

    if ok:
        print("KERNEL_OK")
</pallas_src>

<mosaic_0001>
module attributes {stable_mosaic.version = 11 : i64} {
  func.func @_linear_act_kernel(%arg0: i32, %arg1: memref<8x64xf32, #tpu.memory_space<vmem>>, %arg2: memref<64x32xf32, #tpu.memory_space<vmem>>, %arg3: memref<1x32xf32, #tpu.memory_space<vmem>>, %arg4: memref<8x32xf32, #tpu.memory_space<vmem>>) attributes {dimension_semantics = [#tpu.dimension_semantics<parallel>], iteration_bounds = array<i64: 1>, scalar_prefetch = 0 : i64, scratch_operands = 0 : i64, tpu.core_type = #tpu.core_type<tc>, window_params = [{transform_indices = @transform_0, window_bounds = array<i64: 8, 64>}, {pipeline_mode = #tpu.pipeline_mode<synchronous>, transform_indices = @transform_1, window_bounds = array<i64: 64, 32>}, {pipeline_mode = #tpu.pipeline_mode<synchronous>, transform_indices = @transform_2, window_bounds = array<i64: 1, 32>}, {transform_indices = @transform_3, window_bounds = array<i64: 8, 32>}]} {
    %c0 = arith.constant 0 : index
    %c0_0 = arith.constant 0 : index
    %0 = vector.load %arg1[%c0, %c0_0] : memref<8x64xf32, #tpu.memory_space<vmem>>, vector<8x64xf32>
    %c0_1 = arith.constant 0 : index
    %c0_2 = arith.constant 0 : index
    %1 = vector.load %arg2[%c0_1, %c0_2] : memref<64x32xf32, #tpu.memory_space<vmem>>, vector<64x32xf32>
    %cst = arith.constant dense<0.000000e+00> : vector<8x32xf32>
    %2 = tpu.matmul %0, %1, %cst {dimension_numbers = #tpu.dot_dimension_numbers<[1], [0], [0], [1], [0, 0, 1, 1], [], []>} : vector<8x64xf32>, vector<64x32xf32>, vector<8x32xf32> -> vector<8x32xf32>
    %c0_3 = arith.constant 0 : index
    %c0_4 = arith.constant 0 : index
    %3 = vector.load %arg3[%c0_3, %c0_4] : memref<1x32xf32, #tpu.memory_space<vmem>>, vector<1x32xf32>
    %4 = vector.broadcast %3 : vector<1x32xf32> to vector<8x32xf32>
    %5 = arith.addf %2, %4 : vector<8x32xf32>
    %6 = arith.negf %5 : vector<8x32xf32>
    %7 = math.exp %6 : vector<8x32xf32>
    %cst_5 = arith.constant 1.000000e+00 : f32
    %8 = vector.broadcast %cst_5 : f32 to vector<8x32xf32>
    %9 = arith.addf %8, %7 : vector<8x32xf32>
    %10 = arith.divf %8, %9 : vector<8x32xf32>
    %c0_6 = arith.constant 0 : index
    %c0_7 = arith.constant 0 : index
    %11 = vector.load %arg4[%c0_6, %c0_7] : memref<8x32xf32, #tpu.memory_space<vmem>>, vector<8x32xf32>
    tpu.vector_store %arg4[%c0_6, %c0_7], %10 {strides = array<i32>} : memref<8x32xf32, #tpu.memory_space<vmem>>, vector<8x32xf32>,
    return
  }
  func.func @transform_0(%arg0: i32) -> (i32, i32) {
    %c0_i32 = arith.constant 0 : i32
    %c0_i32_0 = arith.constant 0 : i32
    return %arg0, %c0_i32 : i32, i32
  }
  func.func @transform_1(%arg0: i32) -> (i32, i32) {
    %c0_i32 = arith.constant 0 : i32
    %c0_i32_0 = arith.constant 0 : i32
    %c0_i32_1 = arith.constant 0 : i32
    return %c0_i32, %c0_i32_0 : i32, i32
  }
  func.func @transform_2(%arg0: i32) -> (i32, i32) {
    %c0_i32 = arith.constant 0 : i32
    %c0_i32_0 = arith.constant 0 : i32
    %c0_i32_1 = arith.constant 0 : i32
    return %c0_i32, %c0_i32_0 : i32, i32
  }
  func.func @transform_3(%arg0: i32) -> (i32, i32) {
    %c0_i32 = arith.constant 0 : i32
    %c0_i32_0 = arith.constant 0 : i32
    return %arg0, %c0_i32 : i32, i32
  }
}

</mosaic_0001>

<bundles_post_ra>
// kernel: tpu_custom_call.1
= control target key start
LH: loop header
LB: loop body
LE: loop exit
PB: predicated region body
PF: predicated region fallthrough
CT: control target
= control target key end

     0   :  { %v187_v1 = vmov 0.0   ;;  %vm188_vm0 = vmmov 0   ;;  %s243_s0 = inlined_call_operand.vmem [shape: f32[8,64], index: 0, kind: input, shape index: {}]   ;;  %s244_s1 = inlined_call_operand.vmem [shape: f32[64,32], index: 1, kind: input, shape index: {}]   ;;  %s245_s2 = inlined_call_operand.vmem [shape: f32[1,32], index: 2, kind: input, shape index: {}]   ;;  %s246_s3 = inlined_call_operand.hbm [shape: f32[8,32], index: 3, kind: output, shape index: {}]  }
   0x1   :  { %v23_v0 = vld [vmem:[%s244_s1 + $0x38] sm:$0xff]  ;;  %139 = vmatprep.subr.mxu0 %v187_v1  ;;  %v22_v2 = vld [vmem:[%s244_s1 + $0x30] sm:$0xff]  ;;  %155 = vmatprep.mubr.msk.f32.mxu0 %vm188_vm0, %v187_v1  ;;  %v21_v3 = vld [vmem:[%s244_s1 + $0x28] sm:$0xff] }
   0x2   :  { %140 = vmatpush3.msra.mxu0 %v23_v0 }
   0x3   :  { %141 = vmatprep.subr.mxu0 %v187_v1 }
   0x4   :  { %8 = vsyncpa [#allocation3], 0  ;;  %142 = vmatpush3.msra.mxu0 %v22_v2  ;;  %v20_v4 = vld [vmem:[%s244_s1 + $0x20] sm:$0xff]  ;;  %v19_v5 = vld [vmem:[%s244_s1 + $0x18] sm:$0xff]  ;;  %vm31_vm1 = vcmask 523264   ;;  %vm111_vm2 = vcmask 261120  }
   0x5   :  { %143 = vmatprep.subr.mxu0 %v187_v1  ;;  %v18_v6 = vld [vmem:[%s244_s1 + $0x10] sm:$0xff]  ;;  %v17_v7 = vld [vmem:[%s244_s1 + $0x8] sm:$0xff]  ;;  %v16_v8 = vld [vmem:[%s244_s1] sm:$0xff]  ;;  %s189_s1 = smov [#allocation2]  }
   0x6   :  { %144 = vmatpush3.msra.mxu0 %v21_v3  ;;  %v15_v9 = vld [vmem:[%s243_s0] sm:$0xff]  ;;  %s119_s5 = sshll.u32 %s189_s1, 4  ;;  %s120_s5 = int_to_ptr.vmem [resolvable:$true] %s119_s5 }
   0x7   :  { %145 = vmatprep.subr.mxu0 %v187_v1  ;;  %v127_v10 = vld [vmem:[%s245_s2] ss:$0 sm:$0xff]  ;;  %s165_s0 = scalar_lea.vmem %s120_s5, 128  ;;  %p170_p1 = scmp.lt.s32.totalorder %s120_s5, %s120_s5 }
   0x8   :  { %146 = vmatpush3.msra.mxu0 %v20_v4  ;;  %p166_p0 = scmp.ne.s32.totalorder %s120_s5, %s165_s0  ;;  %p171_p2 = scmp.lt.s32.totalorder %s165_s0, %s165_s0 }
   0x9   :  { %147 = vmatprep.subr.mxu0 %v187_v1 }
   0xa   :  { %148 = vmatpush3.msra.mxu0 %v19_v5  ;;  %p172_p3 = por %p171_p2, %p170_p1 }
   0xb   :  { %149 = vmatprep.subr.mxu0 %v187_v1 }
   0xc   :  { %150 = vmatpush3.msra.mxu0 %v18_v6  ;;  %p173_p4 = pnand %p172_p3, %p166_p0 }
   0xd   :  { %151 = vmatprep.subr.mxu0 %v187_v1 }
   0xe   :  { %152 = vmatpush3.msra.mxu0 %v17_v7 }
   0xf   :  { %153 = vmatprep.subr.mxu0 %v187_v1 }
  0x10   :  { %154 = vmatpush3.msra.mxu0 %v16_v8 }
  0x11   :  { %156 = vmatmul.mubr.msk.f32.vlgmr.msra.gmra.mxu0 %vm31_vm1, %v15_v9 }
  0xd1   :  { %v101_v11 = vpop.f32.mrf.mxu0 }
  0xd2   :  { %v102_v12 = vadd.f32 %v127_v10, %v101_v11 }
  0xd3   :  { %v157_v13 = vpop.f32.mrf.mxu0 }
  0xd4   :  { %v129_v14 = vmul.f32 -1.442695, %v102_v12 }
  0xd6   :  { %161 = vpow2.f32 %v129_v14 }
  0xe3   :  { %v162_v15 = vpop.eup %161 }
  0xe4   :  { %v108_v16 = vadd.f32 1.0, %v162_v15 }
  0xe6   :  { %163 = vrcp.f32 %v108_v16 }
  0xf3   :  { %v164_v17 = vpop.eup %163 }
  0xf4   :  { %112 = vst.msk [vmem:[#allocation2] sm:$0xff] %vm111_vm2, %v164_v17 }
  0xf5   :  { %176 = shalt.err (!%p173_p4)
}
  0xf6   :  { %122 = dma.vmem_to_hbm [thread:$0]  %s120_s5, 128, %s246_s3, [#allocation3]  }
  0xf7   :  { %185 = dma.done.wait [#allocation3], 128  }
  0xf8   :  { %186 = vsyncadd [#allocation3], 4294967168 }
  0xf9   :  { %126 = vsyncpa [#allocation3], 1 }

</bundles_post_ra>
